<compile_context>
chip_gen: v7x
topology: tpu7x:2x2x1
jax: 0.10.0
libtpu: 0.0.40
codegen_flags: <defaults>
</compile_context>

<pallas_src>
import functools
import math

import jax
import jax.numpy as jnp
from jax.experimental import pallas as pl
from jax.experimental.pallas import tpu as pltpu


def _principal_agent_kernel(sample, H, NB, A,
                            obs_ref, w1_ref, w2_ref, wh_ref, b_ref, aux_ref,
                            out_ref):
    """One fused forward pass for a (TB, P) batch tile.

    aux_ref is (TB, NB*A) f32 Gumbel noise when sampling, else (TB, NB) int32 actions.
    out_ref is the lane-dense slab (TB, NB*A + NB + 3):
        [:, :NB*A]           per-bracket softmax probs (bracket-major)
        [:, NB*A:NB*A+NB]    actions (as f32, exact small ints)
        [:, -3], [:, -2], [:, -1]   logprobs, entropy, values
    """
    TB = obs_ref.shape[0]

    b1 = b_ref[0:1, :H]                      # (1, H)
    b2 = b_ref[1:2, :H]                      # (1, H)
    bh = b_ref[2:3, :NB * A + 1]             # (1, NB*A + 1)

    # ---- MLP trunk (MXU matmuls + VPU ReLU) ----
    h = jnp.dot(obs_ref[...], w1_ref[...], preferred_element_type=jnp.float32) + b1
    h = jnp.maximum(h, 0.0)
    h = jnp.dot(h, w2_ref[...], preferred_element_type=jnp.float32) + b2
    h = jnp.maximum(h, 0.0)

    # ---- all actor heads + critic fused into one matmul ----
    logits_all = jnp.dot(h, wh_ref[...], preferred_element_type=jnp.float32) + bh  # (TB, NB*A+1)
    values = logits_all[:, NB * A:NB * A + 1]                                       # (TB, 1)

    lane_idx = jax.lax.broadcasted_iota(jnp.int32, (TB, A), 1)

    if not sample:
        act_all = aux_ref[...]               # (TB, NB) int32, hoisted out of the loop

    lp_sum = jnp.zeros((TB, 1), jnp.float32)
    ent_sum = jnp.zeros((TB, 1), jnp.float32)
    p_cols = []
    act_cols = []

    for i in range(NB):
        logits = logits_all[:, i * A:(i + 1) * A]                    # (TB, A)

        # numerically-stable softmax / log-softmax (matches torch Categorical)
        mx = jnp.max(logits, axis=-1, keepdims=True)
        z = logits - mx
        ez = jnp.exp(z)
        denom = jnp.sum(ez, axis=-1, keepdims=True)
        logp = z - jnp.log(denom)                                    # (TB, A)
        p = ez / denom                                               # exact normalization

        if sample:
            # Gumbel-max: argmax_a (logits + g); noise precomputed outside the kernel.
            g = aux_ref[:, i * A:(i + 1) * A]
            score = logits + g
            smax = jnp.max(score, axis=-1, keepdims=True)
            cand = jnp.where(score >= smax, lane_idx, A)             # int lanes, first argmax
            act_i = jnp.min(cand, axis=-1, keepdims=True)            # (TB, 1) int32
        else:
            act_i = act_all[:, i:i + 1]                              # (TB, 1) int32

        onehot = (lane_idx == act_i).astype(jnp.float32)             # (TB, A)
        lp_sum = lp_sum + jnp.sum(logp * onehot, axis=-1, keepdims=True)
        ent_sum = ent_sum - jnp.sum(p * logp, axis=-1, keepdims=True)

        p_cols.append(p)
        act_cols.append(act_i.astype(jnp.float32))

    # single lane-dense store for everything
    slab = jnp.concatenate(p_cols + act_cols + [lp_sum, ent_sum, values], axis=1)
    out_ref[...] = slab


def init_params(key, principal_obs_length, num_brackets, discretized_bracket_length, hidden_dim):
    """Orthogonal init mirroring the module's layer_init, pre-packed into the fused
    kernel layout (actor heads + critic concatenated, biases packed into one array)."""
    A = discretized_bracket_length + 1
    k1, k2, kh, kc = jax.random.split(key, 4)
    orth = lambda k, shp, s: jax.nn.initializers.orthogonal(s)(k, shp, jnp.float32)
    sqrt2 = math.sqrt(2.0)

    head_ws = [orth(k, (hidden_dim, A), 0.01) for k in jax.random.split(kh, num_brackets)]
    wc = orth(kc, (hidden_dim, 1), 1.0)
    w_head = jnp.concatenate(head_ws + [wc], axis=1)          # (H, NB*A + 1), critic is last col

    w_max = max(hidden_dim, num_brackets * A + 1)
    # rows: b1 | b2 | [b_heads..., b_critic]; all zeros per layer_init(bias_const=0)
    b_packed = jnp.zeros((3, w_max), jnp.float32)

    return {
        "w1": orth(k1, (principal_obs_length, hidden_dim), sqrt2),
        "w2": orth(k2, (hidden_dim, hidden_dim), sqrt2),
        "w_head": w_head,
        "b_packed": b_packed,
        "num_brackets": num_brackets,
        "action_dim": A,
    }


def principal_agent_forward(params, obs, action=None, key=None):
    obs = obs.astype(jnp.float32)
    B, P = obs.shape
    H = params["w1"].shape[1]
    NB = params["num_brackets"]
    A = params["action_dim"]
    W_out = NB * A + NB + 3

    sample = action is None
    if sample:
        if key is None:
            key = jax.random.PRNGKey(0)
        # Gumbel noise generated with the portable JAX PRNG (per-row independent,
        # so a parallel batch grid never correlates streams).
        aux = jax.random.gumbel(key, (B, NB * A), jnp.float32)
        aux_width = NB * A
    else:
        aux = action.astype(jnp.int32)
        aux_width = NB

    # batch tile: whole batch when small; shard big batches over a parallel grid axis
    TB = B if B <= 512 else 512
    grid = (pl.cdiv(B, TB),)

    in_specs = [
        pl.BlockSpec((TB, P), lambda i: (i, 0)),                       # obs
        pl.BlockSpec((P, H), lambda i: (0, 0)),                        # w1
        pl.BlockSpec((H, H), lambda i: (0, 0)),                        # w2
        pl.BlockSpec((H, NB * A + 1), lambda i: (0, 0)),               # fused heads + critic
        pl.BlockSpec(params["b_packed"].shape, lambda i: (0, 0)),      # packed biases
        pl.BlockSpec((TB, aux_width), lambda i: (i, 0)),               # gumbel noise or actions
    ]
    out_specs = pl.BlockSpec((TB, W_out), lambda i: (i, 0))

    flops = 2 * B * (P * H + H * H + H * (NB * A + 1))
    bytes_accessed = 4 * (obs.size + params["w1"].size + params["w2"].size
                          + params["w_head"].size + params["b_packed"].size
                          + aux.size + B * W_out)
    cost = pl.CostEstimate(flops=flops,
                           transcendentals=2 * B * NB * (A + 1),
                           bytes_accessed=bytes_accessed)

    kernel = functools.partial(_principal_agent_kernel, sample, H, NB, A)

    slab = pl.pallas_call(
        kernel,
        grid=grid,
        out_shape=jax.ShapeDtypeStruct((B, W_out), jnp.float32),
        in_specs=in_specs,
        out_specs=out_specs,
        compiler_params=pltpu.CompilerParams(dimension_semantics=("parallel",)),
        cost_estimate=cost,
    )(obs, params["w1"], params["w2"], params["w_head"], params["b_packed"], aux)

    dist = slab[:, :NB * A].reshape(B, NB, A).transpose(1, 0, 2)       # (NB, B, A)
    actions = slab[:, NB * A:NB * A + NB].astype(jnp.int32)            # (B, NB)
    logprobs = slab[:, NB * A + NB]                                    # (B,)
    entropy = slab[:, NB * A + NB + 1]                                 # (B,)
    values = slab[:, NB * A + NB + 2]                                  # (B,)

    return {
        "actions": actions,
        "logprobs": logprobs,
        "entropy": entropy,
        "values": values,
        "distribution": dist,
    }


def _reference_forward(params, obs, action):
    """Pure-JAX reference (evaluate path) for a sanity check."""
    NB = params["num_brackets"]
    A = params["action_dim"]
    H = params["w1"].shape[1]
    hp = jax.lax.Precision.HIGHEST
    h = jnp.maximum(jnp.dot(obs, params["w1"], precision=hp) + params["b_packed"][0, :H], 0.0)
    h = jnp.maximum(jnp.dot(h, params["w2"], precision=hp) + params["b_packed"][1, :H], 0.0)
    logits_all = jnp.dot(h, params["w_head"], precision=hp) + params["b_packed"][2, :NB * A + 1]
    values = logits_all[:, NB * A]
    lp_sum = 0.0
    ent_sum = 0.0
    dists = []
    for i in range(NB):
        logits = logits_all[:, i * A:(i + 1) * A]
        logp = jax.nn.log_softmax(logits, axis=-1)
        p = jnp.exp(logp)
        dists.append(p)
        lp_sum = lp_sum + jnp.take_along_axis(logp, action[:, i:i + 1], axis=-1)[:, 0]
        ent_sum = ent_sum - jnp.sum(p * logp, axis=-1)
    return {"logprobs": lp_sum, "entropy": ent_sum, "values": values,
            "distribution": jnp.stack(dists)}


if __name__ == "__main__":
    # small shapes consistent with the module's constructor
    principal_obs_length = 16
    num_brackets = 3
    discretized_bracket_length = 7   # -> action head width A = 8
    hidden_dim = 32
    batch = 8

    root = jax.random.PRNGKey(0)
    pkey, okey, skey = jax.random.split(root, 3)
    params = init_params(pkey, principal_obs_length, num_brackets,
                         discretized_bracket_length, hidden_dim)
    obs = jax.random.normal(okey, (batch, principal_obs_length), jnp.float32)

    # action=None path: Gumbel-max sampling from the policy inside the kernel
    out = principal_agent_forward(params, obs, action=None, key=skey)
    out = jax.block_until_ready(out)

    # given-action path: evaluate log-probs / entropy for the sampled actions
    out2 = principal_agent_forward(params, obs, action=out["actions"])
    out2 = jax.block_until_ready(out2)

    # sanity checks against a pure-JAX reference (evaluate path is deterministic)
    ref = _reference_forward(params, obs.astype(jnp.float32), out["actions"])
    assert out2["actions"].shape == (batch, num_brackets)
    assert out2["distribution"].shape == (num_brackets, batch, discretized_bracket_length + 1)
    assert jnp.all(jnp.abs(jnp.sum(out2["distribution"], axis=-1) - 1.0) < 1e-3)
    assert jnp.allclose(out2["logprobs"], ref["logprobs"], atol=1e-2, rtol=1e-2)
    assert jnp.allclose(out2["entropy"], ref["entropy"], atol=1e-2, rtol=1e-2)
    assert jnp.allclose(out2["values"], ref["values"], atol=1e-2, rtol=1e-2)
    assert jnp.allclose(out2["distribution"], ref["distribution"], atol=1e-2, rtol=1e-2)
    assert jnp.all(out["actions"] >= 0) and jnp.all(out["actions"] <= discretized_bracket_length)

    print("KERNEL_OK")
</pallas_src>

<mosaic_0001>
module attributes {stable_mosaic.version = 11 : i64} {
  func.func @_principal_agent_kernel(%arg0: i32, %arg1: memref<8x16xf32, #tpu.memory_space<vmem>>, %arg2: memref<16x32xf32, #tpu.memory_space<vmem>>, %arg3: memref<32x32xf32, #tpu.memory_space<vmem>>, %arg4: memref<32x25xf32, #tpu.memory_space<vmem>>, %arg5: memref<3x32xf32, #tpu.memory_space<vmem>>, %arg6: memref<8x24xf32, #tpu.memory_space<vmem>>, %arg7: memref<8x30xf32, #tpu.memory_space<vmem>>) attributes {dimension_semantics = [#tpu.dimension_semantics<parallel>], iteration_bounds = array<i64: 1>, scalar_prefetch = 0 : i64, scratch_operands = 0 : i64, tpu.core_type = #tpu.core_type<tc>, window_params = [{transform_indices = @transform_0, window_bounds = array<i64: 8, 16>}, {pipeline_mode = #tpu.pipeline_mode<synchronous>, transform_indices = @transform_1, window_bounds = array<i64: 16, 32>}, {pipeline_mode = #tpu.pipeline_mode<synchronous>, transform_indices = @transform_2, window_bounds = array<i64: 32, 32>}, {pipeline_mode = #tpu.pipeline_mode<synchronous>, transform_indices = @transform_3, window_bounds = array<i64: 32, 25>}, {pipeline_mode = #tpu.pipeline_mode<synchronous>, transform_indices = @transform_4, window_bounds = array<i64: 3, 32>}, {transform_indices = @transform_5, window_bounds = array<i64: 8, 24>}, {transform_indices = @transform_6, window_bounds = array<i64: 8, 30>}]} {
    %c0 = arith.constant 0 : index
    %c0_0 = arith.constant 0 : index
    %0 = vector.load %arg5[%c0, %c0_0] : memref<3x32xf32, #tpu.memory_space<vmem>>, vector<1x32xf32>
    %c1 = arith.constant 1 : index
    %c0_1 = arith.constant 0 : index
    %1 = vector.load %arg5[%c1, %c0_1] : memref<3x32xf32, #tpu.memory_space<vmem>>, vector<1x32xf32>
    %c2 = arith.constant 2 : index
    %c0_2 = arith.constant 0 : index
    %2 = vector.load %arg5[%c2, %c0_2] : memref<3x32xf32, #tpu.memory_space<vmem>>, vector<1x25xf32>
    %c0_3 = arith.constant 0 : index
    %c0_4 = arith.constant 0 : index
    %3 = vector.load %arg1[%c0_3, %c0_4] : memref<8x16xf32, #tpu.memory_space<vmem>>, vector<8x16xf32>
    %c0_5 = arith.constant 0 : index
    %c0_6 = arith.constant 0 : index
    %4 = vector.load %arg2[%c0_5, %c0_6] : memref<16x32xf32, #tpu.memory_space<vmem>>, vector<16x32xf32>
    %cst = arith.constant dense<0.000000e+00> : vector<8x32xf32>
    %5 = tpu.matmul %3, %4, %cst {dimension_numbers = #tpu.dot_dimension_numbers<[1], [0], [0], [1], [0, 0, 1, 1], [], []>} : vector<8x16xf32>, vector<16x32xf32>, vector<8x32xf32> -> vector<8x32xf32>
    %6 = vector.broadcast %0 : vector<1x32xf32> to vector<8x32xf32>
    %7 = arith.addf %5, %6 : vector<8x32xf32>
    %cst_7 = arith.constant 0.000000e+00 : f32
    %8 = vector.broadcast %cst_7 : f32 to vector<8x32xf32>
    %9 = arith.maximumf %7, %8 : vector<8x32xf32>
    %c0_8 = arith.constant 0 : index
    %c0_9 = arith.constant 0 : index
    %10 = vector.load %arg3[%c0_8, %c0_9] : memref<32x32xf32, #tpu.memory_space<vmem>>, vector<32x32xf32>
    %cst_10 = arith.constant dense<0.000000e+00> : vector<8x32xf32>
    %11 = tpu.matmul %9, %10, %cst_10 {dimension_numbers = #tpu.dot_dimension_numbers<[1], [0], [0], [1], [0, 0, 1, 1], [], []>} : vector<8x32xf32>, vector<32x32xf32>, vector<8x32xf32> -> vector<8x32xf32>
    %12 = vector.broadcast %1 : vector<1x32xf32> to vector<8x32xf32>
    %13 = arith.addf %11, %12 : vector<8x32xf32>
    %cst_11 = arith.constant 0.000000e+00 : f32
    %14 = vector.broadcast %cst_11 : f32 to vector<8x32xf32>
    %15 = arith.maximumf %13, %14 : vector<8x32xf32>
    %c0_12 = arith.constant 0 : index
    %c0_13 = arith.constant 0 : index
    %16 = vector.load %arg4[%c0_12, %c0_13] : memref<32x25xf32, #tpu.memory_space<vmem>>, vector<32x25xf32>
    %cst_14 = arith.constant dense<0.000000e+00> : vector<8x25xf32>
    %17 = tpu.matmul %15, %16, %cst_14 {dimension_numbers = #tpu.dot_dimension_numbers<[1], [0], [0], [1], [0, 0, 1, 1], [], []>} : vector<8x32xf32>, vector<32x25xf32>, vector<8x25xf32> -> vector<8x25xf32>
    %18 = vector.broadcast %2 : vector<1x25xf32> to vector<8x25xf32>
    %19 = arith.addf %17, %18 : vector<8x25xf32>
    %20 = vector.extract_strided_slice %19 {offsets = [0, 24], sizes = [8, 1], strides = [1, 1]} : vector<8x25xf32> to vector<8x1xf32>
    %21 = tpu.iota {dimensions = array<i32: 1>} : vector<8x8xi32>
    %cst_15 = arith.constant 0.000000e+00 : f32
    %22 = vector.broadcast %cst_15 : f32 to vector<8x1xf32>
    %cst_16 = arith.constant 0.000000e+00 : f32
    %23 = vector.broadcast %cst_16 : f32 to vector<8x1xf32>
    %24 = vector.extract_strided_slice %19 {offsets = [0, 0], sizes = [8, 8], strides = [1, 1]} : vector<8x25xf32> to vector<8x8xf32>
    %cst_17 = arith.constant dense<0xFF800000> : vector<8xf32>
    %25 = vector.multi_reduction <maximumf>, %24, %cst_17 [1] : vector<8x8xf32> to vector<8xf32>
    %26 = vector.shape_cast %25 : vector<8xf32> to vector<8x1xf32>
    %27 = vector.broadcast %26 : vector<8x1xf32> to vector<8x8xf32>
    %28 = arith.subf %24, %27 : vector<8x8xf32>
    %29 = math.exp %28 : vector<8x8xf32>
    %cst_18 = arith.constant dense<0.000000e+00> : vector<8xf32>
    %30 = vector.multi_reduction <add>, %29, %cst_18 [1] : vector<8x8xf32> to vector<8xf32>
    %31 = vector.shape_cast %30 : vector<8xf32> to vector<8x1xf32>
    %32 = math.log %31 : vector<8x1xf32>
    %33 = vector.broadcast %32 : vector<8x1xf32> to vector<8x8xf32>
    %34 = arith.subf %28, %33 : vector<8x8xf32>
    %35 = vector.broadcast %31 : vector<8x1xf32> to vector<8x8xf32>
    %36 = arith.divf %29, %35 : vector<8x8xf32>
    %c0_19 = arith.constant 0 : index
    %c0_20 = arith.constant 0 : index
    %37 = vector.load %arg6[%c0_19, %c0_20] : memref<8x24xf32, #tpu.memory_space<vmem>>, vector<8x8xf32>
    %38 = arith.addf %24, %37 : vector<8x8xf32>
    %cst_21 = arith.constant dense<0xFF800000> : vector<8xf32>
    %39 = vector.multi_reduction <maximumf>, %38, %cst_21 [1] : vector<8x8xf32> to vector<8xf32>
    %40 = vector.shape_cast %39 : vector<8xf32> to vector<8x1xf32>
    %41 = vector.broadcast %40 : vector<8x1xf32> to vector<8x8xf32>
    %42 = arith.cmpf oge, %38, %41 : vector<8x8xf32>
    %c8_i32 = arith.constant 8 : i32
    %43 = vector.broadcast %c8_i32 : i32 to vector<8x8xi32>
    %44 = arith.select %42, %21, %43 : vector<8x8xi1>, vector<8x8xi32>
    %cst_22 = arith.constant dense<2147483647> : vector<8xi32>
    %45 = vector.multi_reduction <minsi>, %44, %cst_22 [1] : vector<8x8xi32> to vector<8xi32>
    %46 = vector.shape_cast %45 : vector<8xi32> to vector<8x1xi32>
    %47 = vector.broadcast %46 : vector<8x1xi32> to vector<8x8xi32>
    %48 = arith.cmpi eq, %21, %47 : vector<8x8xi32>
    %49 = arith.extui %48 : vector<8x8xi1> to vector<8x8xi32>
    %50 = arith.sitofp %49 : vector<8x8xi32> to vector<8x8xf32>
    %51 = arith.mulf %34, %50 : vector<8x8xf32>
    %cst_23 = arith.constant dense<0.000000e+00> : vector<8xf32>
    %52 = vector.multi_reduction <add>, %51, %cst_23 [1] : vector<8x8xf32> to vector<8xf32>
    %53 = vector.shape_cast %52 : vector<8xf32> to vector<8x1xf32>
    %54 = arith.addf %22, %53 : vector<8x1xf32>
    %55 = arith.mulf %36, %34 : vector<8x8xf32>
    %cst_24 = arith.constant dense<0.000000e+00> : vector<8xf32>
    %56 = vector.multi_reduction <add>, %55, %cst_24 [1] : vector<8x8xf32> to vector<8xf32>
    %57 = vector.shape_cast %56 : vector<8xf32> to vector<8x1xf32>
    %58 = arith.subf %23, %57 : vector<8x1xf32>
    %59 = arith.sitofp %46 : vector<8x1xi32> to vector<8x1xf32>
    %60 = vector.extract_strided_slice %19 {offsets = [0, 8], sizes = [8, 8], strides = [1, 1]} : vector<8x25xf32> to vector<8x8xf32>
    %cst_25 = arith.constant dense<0xFF800000> : vector<8xf32>
    %61 = vector.multi_reduction <maximumf>, %60, %cst_25 [1] : vector<8x8xf32> to vector<8xf32>
    %62 = vector.shape_cast %61 : vector<8xf32> to vector<8x1xf32>
    %63 = vector.broadcast %62 : vector<8x1xf32> to vector<8x8xf32>
    %64 = arith.subf %60, %63 : vector<8x8xf32>
    %65 = math.exp %64 : vector<8x8xf32>
    %cst_26 = arith.constant dense<0.000000e+00> : vector<8xf32>
    %66 = vector.multi_reduction <add>, %65, %cst_26 [1] : vector<8x8xf32> to vector<8xf32>
    %67 = vector.shape_cast %66 : vector<8xf32> to vector<8x1xf32>
    %68 = math.log %67 : vector<8x1xf32>
    %69 = vector.broadcast %68 : vector<8x1xf32> to vector<8x8xf32>
    %70 = arith.subf %64, %69 : vector<8x8xf32>
    %71 = vector.broadcast %67 : vector<8x1xf32> to vector<8x8xf32>
    %72 = arith.divf %65, %71 : vector<8x8xf32>
    %c0_27 = arith.constant 0 : index
    %c8 = arith.constant 8 : index
    %73 = vector.load %arg6[%c0_27, %c8] : memref<8x24xf32, #tpu.memory_space<vmem>>, vector<8x8xf32>
    %74 = arith.addf %60, %73 : vector<8x8xf32>
    %cst_28 = arith.constant dense<0xFF800000> : vector<8xf32>
    %75 = vector.multi_reduction <maximumf>, %74, %cst_28 [1] : vector<8x8xf32> to vector<8xf32>
    %76 = vector.shape_cast %75 : vector<8xf32> to vector<8x1xf32>
    %77 = vector.broadcast %76 : vector<8x1xf32> to vector<8x8xf32>
    %78 = arith.cmpf oge, %74, %77 : vector<8x8xf32>
    %c8_i32_29 = arith.constant 8 : i32
    %79 = vector.broadcast %c8_i32_29 : i32 to vector<8x8xi32>
    %80 = arith.select %78, %21, %79 : vector<8x8xi1>, vector<8x8xi32>
    %cst_30 = arith.constant dense<2147483647> : vector<8xi32>
    %81 = vector.multi_reduction <minsi>, %80, %cst_30 [1] : vector<8x8xi32> to vector<8xi32>
    %82 = vector.shape_cast %81 : vector<8xi32> to vector<8x1xi32>
    %83 = vector.broadcast %82 : vector<8x1xi32> to vector<8x8xi32>
    %84 = arith.cmpi eq, %21, %83 : vector<8x8xi32>
    %85 = arith.extui %84 : vector<8x8xi1> to vector<8x8xi32>
    %86 = arith.sitofp %85 : vector<8x8xi32> to vector<8x8xf32>
    %87 = arith.mulf %70, %86 : vector<8x8xf32>
    %cst_31 = arith.constant dense<0.000000e+00> : vector<8xf32>
    %88 = vector.multi_reduction <add>, %87, %cst_31 [1] : vector<8x8xf32> to vector<8xf32>
    %89 = vector.shape_cast %88 : vector<8xf32> to vector<8x1xf32>
    %90 = arith.addf %54, %89 : vector<8x1xf32>
    %91 = arith.mulf %72, %70 : vector<8x8xf32>
    %cst_32 = arith.constant dense<0.000000e+00> : vector<8xf32>
    %92 = vector.multi_reduction <add>, %91, %cst_32 [1] : vector<8x8xf32> to vector<8xf32>
    %93 = vector.shape_cast %92 : vector<8xf32> to vector<8x1xf32>
    %94 = arith.subf %58, %93 : vector<8x1xf32>
    %95 = arith.sitofp %82 : vector<8x1xi32> to vector<8x1xf32>
    %96 = vector.extract_strided_slice %19 {offsets = [0, 16], sizes = [8, 8], strides = [1, 1]} : vector<8x25xf32> to vector<8x8xf32>
    %cst_33 = arith.constant dense<0xFF800000> : vector<8xf32>
    %97 = vector.multi_reduction <maximumf>, %96, %cst_33 [1] : vector<8x8xf32> to vector<8xf32>
    %98 = vector.shape_cast %97 : vector<8xf32> to vector<8x1xf32>
    %99 = vector.broadcast %98 : vector<8x1xf32> to vector<8x8xf32>
    %100 = arith.subf %96, %99 : vector<8x8xf32>
    %101 = math.exp %100 : vector<8x8xf32>
    %cst_34 = arith.constant dense<0.000000e+00> : vector<8xf32>
    %102 = vector.multi_reduction <add>, %101, %cst_34 [1] : vector<8x8xf32> to vector<8xf32>
    %103 = vector.shape_cast %102 : vector<8xf32> to vector<8x1xf32>
    %104 = math.log %103 : vector<8x1xf32>
    %105 = vector.broadcast %104 : vector<8x1xf32> to vector<8x8xf32>
    %106 = arith.subf %100, %105 : vector<8x8xf32>
    %107 = vector.broadcast %103 : vector<8x1xf32> to vector<8x8xf32>
    %108 = arith.divf %101, %107 : vector<8x8xf32>
    %c0_35 = arith.constant 0 : index
    %c16 = arith.constant 16 : index
    %109 = vector.load %arg6[%c0_35, %c16] : memref<8x24xf32, #tpu.memory_space<vmem>>, vector<8x8xf32>
    %110 = arith.addf %96, %109 : vector<8x8xf32>
    %cst_36 = arith.constant dense<0xFF800000> : vector<8xf32>
    %111 = vector.multi_reduction <maximumf>, %110, %cst_36 [1] : vector<8x8xf32> to vector<8xf32>
    %112 = vector.shape_cast %111 : vector<8xf32> to vector<8x1xf32>
    %113 = vector.broadcast %112 : vector<8x1xf32> to vector<8x8xf32>
    %114 = arith.cmpf oge, %110, %113 : vector<8x8xf32>
    %c8_i32_37 = arith.constant 8 : i32
    %115 = vector.broadcast %c8_i32_37 : i32 to vector<8x8xi32>
    %116 = arith.select %114, %21, %115 : vector<8x8xi1>, vector<8x8xi32>
    %cst_38 = arith.constant dense<2147483647> : vector<8xi32>
    %117 = vector.multi_reduction <minsi>, %116, %cst_38 [1] : vector<8x8xi32> to vector<8xi32>
    %118 = vector.shape_cast %117 : vector<8xi32> to vector<8x1xi32>
    %119 = vector.broadcast %118 : vector<8x1xi32> to vector<8x8xi32>
    %120 = arith.cmpi eq, %21, %119 : vector<8x8xi32>
    %121 = arith.extui %120 : vector<8x8xi1> to vector<8x8xi32>
    %122 = arith.sitofp %121 : vector<8x8xi32> to vector<8x8xf32>
    %123 = arith.mulf %106, %122 : vector<8x8xf32>
    %cst_39 = arith.constant dense<0.000000e+00> : vector<8xf32>
    %124 = vector.multi_reduction <add>, %123, %cst_39 [1] : vector<8x8xf32> to vector<8xf32>
    %125 = vector.shape_cast %124 : vector<8xf32> to vector<8x1xf32>
    %126 = arith.addf %90, %125 : vector<8x1xf32>
    %127 = arith.mulf %108, %106 : vector<8x8xf32>
    %cst_40 = arith.constant dense<0.000000e+00> : vector<8xf32>
    %128 = vector.multi_reduction <add>, %127, %cst_40 [1] : vector<8x8xf32> to vector<8xf32>
    %129 = vector.shape_cast %128 : vector<8xf32> to vector<8x1xf32>
    %130 = arith.subf %94, %129 : vector<8x1xf32>
    %131 = arith.sitofp %118 : vector<8x1xi32> to vector<8x1xf32>
    %132 = tpu.concatenate %36, %72, %108, %59, %95, %131, %126, %130, %20 in 1 : vector<8x8xf32>, vector<8x8xf32>, vector<8x8xf32>, vector<8x1xf32>, vector<8x1xf32>, vector<8x1xf32>, vector<8x1xf32>, vector<8x1xf32>, vector<8x1xf32> -> vector<8x30xf32>
    %c0_41 = arith.constant 0 : index
    %c0_42 = arith.constant 0 : index
    %133 = vector.load %arg7[%c0_41, %c0_42] : memref<8x30xf32, #tpu.memory_space<vmem>>, vector<8x30xf32>
    tpu.vector_store %arg7[%c0_41, %c0_42], %132 {strides = array<i32>} : memref<8x30xf32, #tpu.memory_space<vmem>>, vector<8x30xf32>,
    return
  }
  func.func @transform_0(%arg0: i32) -> (i32, i32) {
    %c0_i32 = arith.constant 0 : i32
    %c0_i32_0 = arith.constant 0 : i32
    return %arg0, %c0_i32 : i32, i32
  }
  func.func @transform_1(%arg0: i32) -> (i32, i32) {
    %c0_i32 = arith.constant 0 : i32
    %c0_i32_0 = arith.constant 0 : i32
    %c0_i32_1 = arith.constant 0 : i32
    return %c0_i32, %c0_i32_0 : i32, i32
  }
  func.func @transform_2(%arg0: i32) -> (i32, i32) {
    %c0_i32 = arith.constant 0 : i32
    %c0_i32_0 = arith.constant 0 : i32
    %c0_i32_1 = arith.constant 0 : i32
    return %c0_i32, %c0_i32_0 : i32, i32
  }
  func.func @transform_3(%arg0: i32) -> (i32, i32) {
    %c0_i32 = arith.constant 0 : i32
    %c0_i32_0 = arith.constant 0 : i32
    %c0_i32_1 = arith.constant 0 : i32
    return %c0_i32, %c0_i32_0 : i32, i32
  }
  func.func @transform_4(%arg0: i32) -> (i32, i32) {
    %c0_i32 = arith.constant 0 : i32
    %c0_i32_0 = arith.constant 0 : i32
    %c0_i32_1 = arith.constant 0 : i32
    return %c0_i32, %c0_i32_0 : i32, i32
  }
  func.func @transform_5(%arg0: i32) -> (i32, i32) {
    %c0_i32 = arith.constant 0 : i32
    %c0_i32_0 = arith.constant 0 : i32
    return %arg0, %c0_i32 : i32, i32
  }
  func.func @transform_6(%arg0: i32) -> (i32, i32) {
    %c0_i32 = arith.constant 0 : i32
    %c0_i32_0 = arith.constant 0 : i32
    return %arg0, %c0_i32 : i32, i32
  }
}

</mosaic_0001>

<bundles_post_ra>
// kernel: tpu_custom_call.1
= control target key start
LH: loop header
LB: loop body
LE: loop exit
PB: predicated region body
PF: predicated region fallthrough
CT: control target
= control target key end

     0   :  { %11 = vsyncpa [#allocation3], 0  ;;  %s980_s0 = inlined_call_operand.hbm [shape: f32[8,16], index: 0, kind: input, shape index: {}]   ;;  %s981_s1 = inlined_call_operand.hbm [shape: f32[16,32], index: 1, kind: input, shape index: {}]   ;;  %s982_s2 = inlined_call_operand.hbm [shape: f32[32,32], index: 2, kind: input, shape index: {}]   ;;  %s983_s3 = inlined_call_operand.hbm [shape: f32[32,25], index: 3, kind: input, shape index: {}]   ;;  %s984_s4 = inlined_call_operand.vmem [shape: f32[3,32], index: 4, kind: input, shape index: {}]   ;;  %s985_s5 = inlined_call_operand.vmem [shape: f32[8,24], index: 5, kind: input, shape index: {}]   ;;  %s986_s6 = inlined_call_operand.hbm [shape: f32[8,30], index: 6, kind: output, shape index: {}]  }
   0x1   :  { %12 = vsyncpa [#allocation6], 0 }
   0x2   :  { %13 = vsyncpa [#allocation9], 0 }
   0x3   :  { %14 = vsyncpa [#allocation4], 0  ;;  %s766_s21 = smov [#allocation5]   ;;  %s648_s25 = scalar_lea.hbm %s981_s1, 256 }
   0x4   :  { %s30_s22 = sshll.u32 %s766_s21, 4  ;;  %p649_p0 = scmp.ne.s32.totalorder %s981_s1, %s648_s25  ;;  %s31_s22 = int_to_ptr.vmem [resolvable:$true] %s30_s22 }
   0x5   :  { %p652_p1 = scmp.lt.u32.totalorder %s648_s25, %s981_s1 }
   0x7   :  { %p654_p2 = pnand %p652_p1, %p649_p0 }
   0x9   :  { %657 = shalt.err (!%p654_p2)
}
   0xa   :  { %s658_s30 = scalar_lea.vmem %s31_s22, 256  ;;  %p663_p4 = scmp.lt.s32.totalorder %s31_s22, %s31_s22 }
   0xb   :  { %p659_p3 = scmp.ne.s32.totalorder %s31_s22, %s658_s30  ;;  %p664_p5 = scmp.lt.s32.totalorder %s658_s30, %s658_s30 }
   0xd   :  { %p665_p6 = por %p664_p5, %p663_p4 }
   0xf   :  { %p666_p7 = pnand %p665_p6, %p659_p3 }
  0x11   :  { %669 = shalt.err (!%p666_p7)
}
  0x12   :  { %s767_s7 = smov 128   ;;  %s768_s8 = smov 8  }
  0x13   :  { %36 = dma.hbm_to_vmem [thread:$0]  %s981_s1, 256, %s31_s22, [#allocation6], %s767_s7, %s767_s7, %s768_s8  }
  0x14   :  { %s769_s11 = smov [#allocation2]   ;;  %s770_s13 = smov [#allocation7]  }
  0x15   :  { %s21_s12 = sshll.u32 %s769_s11, 4  ;;  %s42_s14 = sshll.u32 %s770_s13, 4  ;;  %s22_s12 = int_to_ptr.vmem [resolvable:$true] %s21_s12  ;;  %s43_s14 = int_to_ptr.vmem [resolvable:$true] %s42_s14 }
  0x16   :  { %s670_s17 = scalar_lea.hbm %s980_s0, 128 }
  0x17   :  { %p671_p8 = scmp.ne.s32.totalorder %s980_s0, %s670_s17  ;;  %p674_p9 = scmp.lt.u32.totalorder %s670_s17, %s980_s0 }
  0x19   :  { %p676_p10 = pnand %p674_p9, %p671_p8 }
  0x1b   :  { %679 = shalt.err (!%p676_p10)
}
  0x1c   :  { %s680_s1 = scalar_lea.vmem %s22_s12, 128  ;;  %p685_p12 = scmp.lt.s32.totalorder %s22_s12, %s22_s12 }
  0x1d   :  { %p681_p11 = scmp.ne.s32.totalorder %s22_s12, %s680_s1  ;;  %p686_p13 = scmp.lt.s32.totalorder %s680_s1, %s680_s1 }
  0x1f   :  { %p687_p0 = por %p686_p13, %p685_p12 }
  0x21   :  { %p688_p1 = pnand %p687_p0, %p681_p11 }
  0x23   :  { %691 = shalt.err (!%p688_p1)
}
  0x24   :  { %24 = dma.hbm_to_vmem [thread:$0]  %s980_s0, 128, %s22_s12, [#allocation3]  }
  0x25   :  { %s692_s26 = scalar_lea.hbm %s982_s2, 512 }
  0x26   :  { %p693_p2 = scmp.ne.s32.totalorder %s982_s2, %s692_s26  ;;  %p696_p3 = scmp.lt.u32.totalorder %s692_s26, %s982_s2 }
  0x28   :  { %p698_p4 = pnand %p696_p3, %p693_p2 }
  0x2a   :  { %701 = shalt.err (!%p698_p4)
}
  0x2b   :  { %s702_s9 = scalar_lea.vmem %s43_s14, 512  ;;  %p707_p6 = scmp.lt.s32.totalorder %s43_s14, %s43_s14 }
  0x2c   :  { %p703_p5 = scmp.ne.s32.totalorder %s43_s14, %s702_s9  ;;  %p708_p7 = scmp.lt.s32.totalorder %s702_s9, %s702_s9 }
  0x2e   :  { %p709_p8 = por %p708_p7, %p707_p6 }
  0x30   :  { %p710_p9 = pnand %p709_p8, %p703_p5 }
  0x32   :  { %713 = shalt.err (!%p710_p9)
}
  0x33   :  { %48 = dma.hbm_to_vmem [thread:$0]  %s982_s2, 512, %s43_s14, [#allocation6], %s767_s7, %s767_s7, %s768_s8  }
  0x34   :  { %s771_s11 = smov [#allocation8]   ;;  %s714_s16 = scalar_lea.hbm %s983_s3, 512 }
  0x35   :  { %s54_s12 = sshll.u32 %s771_s11, 4  ;;  %p715_p10 = scmp.ne.s32.totalorder %s983_s3, %s714_s16  ;;  %s55_s12 = int_to_ptr.vmem [resolvable:$true] %s54_s12 }
  0x36   :  { %p718_p11 = scmp.lt.u32.totalorder %s714_s16, %s983_s3 }
  0x38   :  { %p720_p12 = pnand %p718_p11, %p715_p10 }
  0x3a   :  { %723 = shalt.err (!%p720_p12)
}
  0x3b   :  { %s724_s21 = scalar_lea.vmem %s55_s12, 512  ;;  %p729_p0 = scmp.lt.s32.totalorder %s55_s12, %s55_s12 }
  0x3c   :  { %p725_p13 = scmp.ne.s32.totalorder %s55_s12, %s724_s21  ;;  %p730_p1 = scmp.lt.s32.totalorder %s724_s21, %s724_s21 }
  0x3e   :  { %p731_p2 = por %p730_p1, %p729_p0 }
  0x40   :  { %p732_p3 = pnand %p731_p2, %p725_p13 }
  0x42   :  { %735 = shalt.err (!%p732_p3)
}
  0x43   :  { %60 = dma.hbm_to_vmem [thread:$0]  %s983_s3, 512, %s55_s12, [#allocation9], %s767_s7, %s767_s7, %s768_s8  }
  0x44   :  { %758 = dma.done.wait [#allocation3], 128  }
  0x45   :  { %759 = vsyncadd [#allocation3], 4294967168 }
  0x46   :  { %760 = dma.done.wait [#allocation6], 768  }
  0x47   :  { %761 = vsyncadd [#allocation6], 4294966528 }
  0x48   :  { %762 = dma.done.wait [#allocation9], 512  }
  0x49   :  { %763 = vsyncadd [#allocation9], 4294966784  ;;  %v772_v0 = vmov 0.0|0.0   ;;  %vm773_vm0 = vmmov 0   ;;  %v774_v1 = vmov 0.0   ;;  %v81_v2 = vld [vmem:[#allocation5] sm:$0xff]  ;;  %v326_v23 = vlaneseq }
  0x4a   :  { %601 = vmatprep.subr.bf16.mxu0 %v772_v0  ;;  %576 = vmatprep.mubr.msk.f32.mxu0 %vm773_vm0, %v774_v1  ;;  %v82_v3 = vld [vmem:[#allocation5 + $0x8] sm:$0xff]  ;;  %v162_v5 = vld [vmem:[#allocation7] sm:$0xff]  ;;  %v163_v6 = vld [vmem:[#allocation7 + $0x8] sm:$0xff]  ;;  %vm87_vm1 = vcmask 130048   ;;  %vm170_vm2 = vcmask 261120   ;;  %s775_s1 = smov 16  }
  0x4b   :  { %604 = vmatprep.subr.bf16.mxu1 %v772_v0  ;;  %587 = vmatprep.mubr.msk.f32.mxu1 %vm773_vm0, %v774_v1  ;;  %v602_v4 = vpack.c.bf16 %v82_v3, %v81_v2  ;;  %v605_v7 = vpack.c.bf16 %v163_v6, %v162_v5  ;;  %v80_v8 = vld [vmem:[#allocation2] sm:$0xff]  ;;  %v164_v9 = vld [vmem:[#allocation7 + $0x10] sm:$0xff]  ;;  %v165_v10 = vld [vmem:[#allocation7 + $0x18] sm:$0xff]  ;;  %v883_v24 = vand.u32 127, %v326_v23  ;;  %vm446_vm3 = vcmask 195712   ;;  %s779_s28 = smov [#allocation10]  }
  0x4c   :  { %v608_v11 = vpack.c.bf16 %v165_v10, %v164_v9  ;;  %v245_v12 = vld [vmem:[#allocation8] sm:$0xff]  ;;  %v246_v13 = vld [vmem:[#allocation8 + $0x8] sm:$0xff]  ;;  %v247_v20 = vld [vmem:[#allocation8 + $0x10] sm:$0xff]  ;;  %vm379_vm4 = vcmask 130112   ;;  %vm328_vm7 = vcmask 64512   ;;  %vm519_vm14 = vcmask 195584  }
  0x4d   :  { %603 = vmatpush3.bf16.msra.mxu0 %v602_v4  ;;  %606 = vmatpush3.bf16.msra.mxu1 %v605_v7  ;;  %v611_v14 = vpack.c.bf16 %v246_v13, %v245_v12  ;;  %v550_v15 = vld [vmem:[%s984_s4] ss:$0 sm:$0xff]  ;;  %v248_v21 = vld [vmem:[#allocation8 + $0x18] sm:$0xff]  ;;  %v552_v25 = vld [vmem:[%s984_s4 + $0x1] ss:$0 sm:$0xff]  ;;  %vm521_vm15 = vcmask 203776  }
  0x4e   :  { %610 = vmatprep.subr.bf16.mxu0 %v772_v0  ;;  %607 = vmatprep.subr.bf16.mxu1 %v772_v0  ;;  %v614_v22 = vpack.c.bf16 %v248_v21, %v247_v20  ;;  %v554_v30 = vld [vmem:[%s984_s4 + $0x2] ss:$0 sm:$0xff]  ;;  %s776_s4 = smov 112   ;;  %s539_s29 = sshll.u32 %s779_s28, 4  ;;  %s540_s29 = int_to_ptr.vmem [resolvable:$true] %s539_s29 }
  0x4f   :  { %402 = vrot.lane.b32.xlu1 %v883_v24, %s768_s8  ;;  %v343_v32 = vld [vmem:[%s985_s5] sm:$0xff]  ;;  %s777_s5 = smov 120   ;;  %s736_s30 = scalar_lea.vmem %s540_s29, 128 }
  0x50   :  { %577 = vmatmul.mubr.msk.f32.vlgmr.msra.gmra.mrb[0].mxu0 %vm87_vm1, %v80_v8  ;;  %p737_p4 = scmp.ne.s32.totalorder %s540_s29, %s736_s30  ;;  %p741_p5 = scmp.lt.s32.totalorder %s540_s29, %s540_s29 }
  0x51   :  { %598 = vmatprep.mubr.msk.f32.mxu0 %vm773_vm0, %v774_v1  ;;  %609 = vmatpush3.bf16.msra.mxu1 %v608_v11  ;;  %vm523_vm0 = vcmask 211968   ;;  %p742_p6 = scmp.lt.s32.totalorder %s736_s30, %s736_s30 }
  0x52   :  { %612 = vmatpush3.bf16.msra.mxu0 %v611_v14 }
  0x53   :  { %613 = vmatprep.subr.bf16.mxu0 %v772_v0  ;;  %469 = vrot.lane.b32.xlu1 %v883_v24, %s775_s1  ;;  %p743_p7 = por %p742_p6, %p741_p5 }
  0x55   :  { %p744_p8 = pnand %p743_p7, %p737_p4 }
  0x56   :  { %615 = vmatpush3.bf16.msra.mxu0 %v614_v22 }
  0xc1   :  { %v403_v40 = vpop.permute.xlu1 %402 }
  0xc5   :  { %v470_v41 = vpop.permute.xlu1 %469 }
 0x123   :  { %v157_v16 = vpop.f32.mrb[0].mxu0 }
 0x124   :  { %v158_v17 = vadd.f32 %v550_v15, %v157_v16  ;;  %v578_v18 = vpop.f32.mrb[1].mxu0 }
 0x126   :  { %v161_v19 = vmax.f32 %v158_v17, 0.0 }
 0x128   :  { %588 = vmatmul.mubr.msk.f32.vlgmr.msra.gmra.mrb[0].mxu1 %vm170_vm2, %v161_v19 }
 0x1fb   :  { %v240_v26 = vpop.f32.mrb[0].mxu1 }
 0x1fc   :  { %v241_v27 = vadd.f32 %v552_v25, %v240_v26  ;;  %v589_v28 = vpop.f32.mrb[1].mxu1 }
 0x1fe   :  { %v244_v29 = vmax.f32 %v241_v27, 0.0 }
 0x200   :  { %599 = vmatmul.mubr.msk.f32.vlgmr.msra.gmra.mrb[2].mxu0 %vm170_vm2, %v244_v29 }
 0x2d3   :  { %v322_v31 = vpop.f32.mrb[2].mxu0 }
 0x2d4   :  { %v899_v33 = vadd.f32 %v554_v30, %v322_v31  ;;  %v600_v34 = vpop.f32.mrb[3].mxu0 }
 0x2d6   :  { %v447_v35 = vsel %vm446_vm3, %v899_v33, -inf  ;;  %v344_v36 = vadd.f32 %v343_v32, %v899_v33  ;;  %v380_v39 = vsel %vm379_vm4, %v899_v33, -inf  ;;  %v329_v6 = vsel %vm328_vm7, %v899_v33, -inf }
 0x2d7   :  { %448 = vmax.xlane.f32.xlu1 %v447_v35 }
 0x2d8   :  { %v398_v37 = vsel %vm379_vm4, %v344_v36, -inf  ;;  %v465_v38 = vsel %vm446_vm3, %v344_v36, -inf  ;;  %v345_v56 = vsel %vm328_vm7, %v344_v36, -inf }
 0x2d9   :  { %399 = vmax.xlane.f32.xlu0 %v398_v37 }
 0x2dd   :  { %466 = vmax.xlane.f32.xlu0 %v465_v38 }
 0x2e1   :  { %381 = vmax.xlane.f32.xlu0 %v380_v39 }
 0x364   :  { %v449_v42 = vpop.xlane.xlu1 %448 }
 0x365   :  { %v909_v43 = vsub.f32 %v899_v33, %v449_v42 }
 0x366   :  { %v400_v44 = vpop.xlane.xlu0 %399 }
 0x367   :  { %v451_v45 = vmul.f32 1.442695, %v909_v43  ;;  %vm401_vm5 = vcmp.ge.f32.partialorder %v344_v36, %v400_v44 }
 0x368   :  { %v404_v46 = vsel %vm401_vm5, %v403_v40, 8  ;;  %vm531_vm5 = vcmask 244736  }
 0x369   :  { %630 = vpow2.f32 %v451_v45  ;;  %v405_v47 = vsel %vm379_vm4, %v404_v46, 2147483647  ;;  %vm529_vm4 = vcmask 236544  }
 0x36a   :  { %v467_v48 = vpop.xlane.xlu0 %466  ;;  %v407_v49 = vshra.s32 %v405_v47, 16  ;;  %v406_v61 = vand.u32 65535, %v405_v47 }
 0x36b   :  { %vm468_vm6 = vcmp.ge.f32.partialorder %v344_v36, %v467_v48 }
 0x36c   :  { %v471_v50 = vsel %vm468_vm6, %v470_v41, 8  ;;  %v409_v51 = vcvt.s32.f32 %v407_v49  ;;  %v408_v63 = vcvt.s32.f32 %v406_v61 }
 0x36d   :  { %v472_v52 = vsel %vm446_vm3, %v471_v50, 2147483647  ;;  %vm527_vm3 = vcmask 228352  }
 0x36e   :  { %410 = vmin.xlane.f32.xlu0 %v409_v51  ;;  %v474_v53 = vshra.s32 %v472_v52, 16  ;;  %v382_v57 = vpop.xlane.xlu0 %381  ;;  %v473_v0 = vand.u32 65535, %v472_v52 }
 0x36f   :  { %v920_v58 = vsub.f32 %v899_v33, %v382_v57 }
 0x370   :  { %v476_v54 = vcvt.s32.f32 %v474_v53  ;;  %v475_v4 = vcvt.s32.f32 %v473_v0 }
 0x371   :  { %v384_v59 = vmul.f32 1.442695, %v920_v58 }
 0x372   :  { %477 = vmin.xlane.f32.xlu0 %v476_v54 }
 0x373   :  { %v914_v55 = vpop.eup %630  ;;  %632 = vpow2.f32 %v384_v59 }
 0x374   :  { %454 = vrot.lane.b32.xlu1 %v914_v55, %s776_s4 }
 0x376   :  { %346 = vmax.xlane.f32.xlu0 %v345_v56 }
 0x37d   :  { %v923_v60 = vpop.eup %632 }
 0x38c   :  { %387 = vrot.lane.b32.xlu0 %v923_v60, %s777_s5 }
 0x3e6   :  { %v455_v14 = vpop.permute.xlu1 %454 }
 0x3e7   :  { %v457_v15 = vsel %vm328_vm7, %v455_v14, 0.0 }
 0x3fb   :  { %v411_v62 = vpop.xlane.xlu0 %410 }
 0x3fc   :  { %vm412_vm8 = vcmp.eq.f32.partialorder %v409_v51, %v411_v62  ;;  %v417_v16 = vcvt.f32.s32 %v411_v62 }
 0x3fd   :  { %v413_v2 = vsel %vm412_vm8, %v408_v63, inf }
 0x3fe   :  { %414 = vmin.xlane.f32.xlu0 %v413_v2  ;;  %v418_v18 = vshll.u32 %v417_v16, 16 }
 0x3ff   :  { %v478_v3 = vpop.xlane.xlu0 %477 }
 0x400   :  { %vm479_vm9 = vcmp.eq.f32.partialorder %v476_v54, %v478_v3  ;;  %v484_v19 = vcvt.f32.s32 %v478_v3 }
 0x401   :  { %v480_v5 = vsel %vm479_vm9, %v475_v4, inf }
 0x402   :  { %481 = vmin.xlane.f32.xlu1 %v480_v5  ;;  %330 = vmax.xlane.f32.xlu0 %v329_v6  ;;  %v485_v23 = vshll.u32 %v484_v19, 16 }
 0x403   :  { %v347_v7 = vpop.xlane.xlu0 %346 }
 0x404   :  { %vm348_vm10 = vcmp.ge.f32.partialorder %v344_v36, %v347_v7 }
 0x405   :  { %v349_v8 = vsel %vm348_vm10, %v883_v24, 8 }
 0x406   :  { %v350_v9 = vsel %vm328_vm7, %v349_v8, 2147483647 }
 0x407   :  { %v352_v10 = vshra.s32 %v350_v9, 16  ;;  %v388_v12 = vpop.permute.xlu0 %387  ;;  %v351_v34 = vand.u32 65535, %v350_v9 }
 0x408   :  { %v390_v13 = vsel %vm328_vm7, %v388_v12, 0.0 }
 0x409   :  { %v354_v11 = vcvt.s32.f32 %v352_v10  ;;  %v353_v35 = vcvt.s32.f32 %v351_v34 }
 0x40b   :  { %355 = vmin.xlane.f32.xlu0 %v354_v11 }
 0x40f   :  { %391 = vadd.xlane.f32.xlu0 %v390_v13 }
 0x413   :  { %458 = vadd.xlane.f32.xlu0 %v457_v15 }
 0x48b   :  { %v415_v17 = vpop.xlane.xlu0 %414 }
 0x48c   :  { %v416_v20 = vcvt.f32.s32 %v415_v17 }
 0x48e   :  { %v933_v21 = vadd.s32 %v418_v18, %v416_v20 }
 0x48f   :  { %v482_v22 = vpop.xlane.xlu1 %481  ;;  %v331_v29 = vpop.xlane.xlu0 %330 }
 0x490   :  { %v483_v25 = vcvt.f32.s32 %v482_v22  ;;  %vm420_vm11 = vcmp.eq.s32.totalorder %v883_v24, %v933_v21  ;;  %v332_v30 = vsub.f32 %v899_v33, %v331_v29  ;;  %v445_v7 = vcvt.s32.f32 %v933_v21 }
 0x491   :  { %v557_v26 = vsel %vm420_vm11, 1.0, %v774_v1 }
 0x492   :  { %v938_v27 = vadd.s32 %v485_v23, %v483_v25  ;;  %424 = vrot.lane.b32.xlu0 %v557_v26, %s768_s8  ;;  %v333_v31 = vmul.f32 1.442695, %v332_v30  ;;  %s778_s8 = smov 5  }
 0x494   :  { %vm487_vm12 = vcmp.eq.s32.totalorder %v883_v24, %v938_v27  ;;  %634 = vpow2.f32 %v333_v31  ;;  %v512_v10 = vcvt.s32.f32 %v938_v27 }
 0x495   :  { %v558_v28 = vsel %vm487_vm12, 1.0, %v774_v1 }
 0x496   :  { %491 = vrot.lane.b32.xlu1 %v558_v28, %s775_s1 }
 0x498   :  { %v356_v32 = vpop.xlane.xlu0 %355 }
 0x499   :  { %vm357_vm13 = vcmp.eq.f32.partialorder %v354_v11, %v356_v32 }
 0x49a   :  { %v358_v36 = vsel %vm357_vm13, %v353_v35, inf }
 0x49c   :  { %v392_v39 = vpop.xlane.xlu0 %391 }
 0x49d   :  { %636 = vlog2.f32 %v392_v39 }
 0x49e   :  { %v635_v37 = vpop.eup %634 }
 0x49f   :  { %v335_v38 = vsel %vm328_vm7, %v635_v37, 0.0 }
 0x4a0   :  { %v459_v40 = vpop.xlane.xlu0 %458 }
 0x4a1   :  { %638 = vlog2.f32 %v459_v40 }
 0x4a2   :  { %640 = vrcp.f32 %v459_v40 }
 0x4a3   :  { %642 = vrcp.f32 %v392_v39 }
 0x4a7   :  { %v637_v41 = vpop.eup %636 }
 0x4a8   :  { %v394_v42 = vmul.f32 0.6931472, %v637_v41 }
 0x4aa   :  { %v395_v45 = vsub.f32 %v920_v58, %v394_v42  ;;  %v362_v58 = vcvt.f32.s32 %v356_v32 }
 0x4ab   :  { %v639_v44 = vpop.eup %638 }
 0x4ac   :  { %v461_v46 = vmul.f32 0.6931472, %v639_v44  ;;  %v641_v50 = vpop.eup %640  ;;  %v363_v61 = vshll.u32 %v362_v58, 16 }
 0x4ad   :  { %v464_v53 = vmul.f32 %v641_v50, %v914_v55  ;;  %v643_v62 = vpop.eup %642 }
 0x4ae   :  { %v462_v49 = vsub.f32 %v909_v43, %v461_v46  ;;  %v397_v4 = vmul.f32 %v643_v62, %v923_v60 }
 0x4b0   :  { %v503_v54 = vmul.f32 %v464_v53, %v462_v49  ;;  %v436_v14 = vmul.f32 %v397_v4, %v395_v45 }
 0x4b1   :  { %359 = vmin.xlane.f32.xlu0 %v358_v36 }
 0x4ba   :  { %336 = vadd.xlane.f32.xlu1 %v335_v38 }
 0x504   :  { %v425_v47 = vpop.permute.xlu0 %424 }
 0x505   :  { %v427_v48 = vmul.f32 %v425_v47, %v395_v45 }
 0x507   :  { %429 = vrot.lane.b32.xlu1 %v427_v48, %s777_s5 }
 0x508   :  { %v492_v51 = vpop.permute.xlu1 %491 }
 0x509   :  { %v494_v52 = vmul.f32 %v492_v51, %v462_v49 }
 0x50b   :  { %496 = vrot.lane.b32.xlu1 %v494_v52, %s776_s4 }
 0x50f   :  { %505 = vrot.lane.b32.xlu1 %v503_v54, %s776_s4 }
 0x53e   :  { %v360_v57 = vpop.xlane.xlu0 %359 }
 0x53f   :  { %v361_v59 = vcvt.f32.s32 %v360_v57 }
 0x541   :  { %v364_v63 = vadd.s32 %v363_v61, %v361_v59 }
 0x543   :  { %v378_v5 = vcvt.s32.f32 %v364_v63  ;;  %vm365_vm2 = vcmp.eq.s32.totalorder %v883_v24, %v364_v63 }
 0x544   :  { %v556_v17 = vsel %vm365_vm2, 1.0, %v774_v1 }
 0x547   :  { %v337_v56 = vpop.xlane.xlu1 %336 }
 0x548   :  { %644 = vlog2.f32 %v337_v56 }
 0x549   :  { %646 = vrcp.f32 %v337_v56 }
 0x552   :  { %v645_v43 = vpop.eup %644 }
 0x553   :  { %v647_v0 = vpop.eup %646  ;;  %v339_v2 = vmul.f32 0.6931472, %v645_v43 }
 0x554   :  { %v342_v3 = vmul.f32 %v647_v0, %v635_v37 }
 0x555   :  { %v340_v55 = vsub.f32 %v332_v30, %v339_v2 }
 0x556   :  { %v517_v6 = vsel %vm328_vm7, %v342_v3, %v397_v4 }
 0x557   :  { %v373_v8 = vmul.f32 %v342_v3, %v340_v55  ;;  %v518_v9 = vsel %vm87_vm1, %v517_v6, %v464_v53  ;;  %v368_v18 = vmul.f32 %v556_v17, %v340_v55  ;;  %vm525_vm1 = vcmask 220160  }
 0x558   :  { %v520_v11 = vsel %vm519_vm14, %v518_v9, %v378_v5 }
 0x559   :  { %v374_v12 = vsel %vm328_vm7, %v373_v8, 0.0  ;;  %v522_v13 = vsel %vm521_vm15, %v520_v11, %v445_v7  ;;  %v369_v19 = vsel %vm328_vm7, %v368_v18, 0.0 }
 0x55a   :  { %375 = vadd.xlane.f32.xlu0 %v374_v12  ;;  %v524_v60 = vsel %vm523_vm0, %v522_v13, %v512_v10 }
 0x570   :  { %438 = vrot.lane.b32.xlu0 %v436_v14, %s777_s5 }
 0x579   :  { %v430_v15 = vpop.permute.xlu1 %429 }
 0x57a   :  { %v432_v16 = vsel %vm328_vm7, %v430_v15, 0.0 }
 0x57b   :  { %433 = vadd.xlane.f32.xlu1 %v432_v16 }
 0x57d   :  { %v497_v21 = vpop.permute.xlu1 %496 }
 0x57e   :  { %v499_v25 = vsel %vm328_vm7, %v497_v21, 0.0 }
 0x581   :  { %v506_v26 = vpop.permute.xlu1 %505 }
 0x582   :  { %v508_v24 = vsel %vm328_vm7, %v506_v26, 0.0 }
 0x58c   :  { %514 = vrot.lane.b32.xlu1 %v899_v33, %s778_s8 }
 0x58f   :  { %370 = vadd.xlane.f32.xlu0 %v369_v19 }
 0x5e7   :  { %v376_v20 = vpop.xlane.xlu0 %375 }
 0x5e8   :  { %v377_v30 = vsub.f32 0.0, %v376_v20 }
 0x5eb   :  { %v439_v22 = vpop.permute.xlu0 %438 }
 0x5ec   :  { %v441_v23 = vsel %vm328_vm7, %v439_v22, 0.0 }
 0x5ed   :  { %442 = vadd.xlane.f32.xlu0 %v441_v23 }
 0x5f1   :  { %500 = vadd.xlane.f32.xlu0 %v499_v25 }
 0x5f5   :  { %509 = vadd.xlane.f32.xlu0 %v508_v24 }
 0x608   :  { %v434_v28 = vpop.xlane.xlu1 %433 }
 0x60c   :  { %v515_v37 = vpop.permute.xlu1 %514 }
 0x61c   :  { %v371_v1 = vpop.xlane.xlu0 %370 }
 0x61d   :  { %v435_v33 = vadd.f32 %v434_v28, %v371_v1 }
 0x67a   :  { %v443_v27 = vpop.xlane.xlu0 %442 }
 0x67b   :  { %v444_v32 = vsub.f32 %v377_v30, %v443_v27 }
 0x67e   :  { %v501_v29 = vpop.xlane.xlu0 %500 }
 0x67f   :  { %v502_v31 = vadd.f32 %v501_v29, %v435_v33 }
 0x681   :  { %v526_v36 = vsel %vm525_vm1, %v524_v60, %v502_v31 }
 0x682   :  { %v510_v34 = vpop.xlane.xlu0 %509 }
 0x683   :  { %v511_v35 = vsub.f32 %v444_v32, %v510_v34 }
 0x685   :  { %v528_v38 = vsel %vm527_vm3, %v526_v36, %v511_v35 }
 0x686   :  { %v530_v39 = vsel %vm529_vm4, %v528_v38, %v515_v37 }
 0x687   :  { %532 = vst.msk [vmem:[#allocation10] sm:$0xff] %vm531_vm5, %v530_v39 }
 0x688   :  { %747 = shalt.err (!%p744_p8)
}
 0x689   :  { %s748_s10 = scalar_lea.hbm %s986_s6, 128 }
 0x68a   :  { %p749_p9 = scmp.ne.s32.totalorder %s986_s6, %s748_s10  ;;  %p752_p10 = scmp.lt.u32.totalorder %s748_s10, %s986_s6 }
 0x68c   :  { %p754_p11 = pnand %p752_p10, %p749_p9 }
 0x68e   :  { %757 = shalt.err (!%p754_p11)
}
 0x68f   :  { %542 = dma.vmem_to_hbm [thread:$0]  %s540_s29, 128, %s986_s6, [#allocation4]  }
 0x690   :  { %764 = dma.done.wait [#allocation4], 128  }
 0x691   :  { %765 = vsyncadd [#allocation4], 4294967168 }
 0x692   :  { %546 = vsyncpa [#allocation3], 1 }
 0x693   :  { %547 = vsyncpa [#allocation6], 1 }
 0x694   :  { %548 = vsyncpa [#allocation9], 1 }
 0x695   :  { %549 = vsyncpa [#allocation4], 1 }

</bundles_post_ra>
